<compile_context>
chip_gen: v7x
topology: tpu7x:2x2x1
jax: 0.10.0
libtpu: 0.0.40
codegen_flags: <defaults>
</compile_context>

<pallas_src>
import jax
import jax.numpy as jnp
from jax.experimental import pallas as pl
from jax.experimental.pallas import tpu as pltpu

_OUT_ROWS = 1   # forward() hard-codes batch_size = 1
_OUT_COLS = 6   # fixed action dimension in the reference module


def _random_policy_kernel(seed_ref, out_ref):
    # Column index 0..5 as int32 (>=2D iota, required on TPU).
    lane = jax.lax.broadcasted_iota(jnp.int32, out_ref.shape, dimension=1)

    # Combine seed and index: seed + (i+1) * 0x9E3779B9 (golden-ratio constant,
    # written as its two's-complement int32 value; int32 mul/add wrap mod 2^32).
    base = seed_ref[0] + (lane + 1) * jnp.int32(-1640531527)

    # lowbias32 finalizer on uint32 (logical shifts).
    x = jax.lax.bitcast_convert_type(base, jnp.uint32)
    x = x ^ (x >> 16)
    x = x * jnp.uint32(0x7FEB352D)
    x = x ^ (x >> 15)
    x = x * jnp.uint32(0x846CA68B)
    x = x ^ (x >> 16)

    # Mantissa trick: top 23 random bits with exponent 127 -> float32 in [1, 2).
    fbits = (x >> 9) | jnp.uint32(0x3F800000)
    u12 = jax.lax.bitcast_convert_type(fbits, jnp.float32)

    # 2 * (u12 - 1) - 1  ==  2*u12 - 3  in [-1, 1), matching 2*rand - 1.
    out_ref[...] = 2.0 * u12 - 3.0


@jax.jit
def _random_policy_pallas(seed_arr):
    return pl.pallas_call(
        _random_policy_kernel,
        out_shape=jax.ShapeDtypeStruct((_OUT_ROWS, _OUT_COLS), jnp.float32),
        in_specs=[pl.BlockSpec(memory_space=pltpu.MemorySpace.SMEM)],
        out_specs=pl.BlockSpec(memory_space=pltpu.MemorySpace.VMEM),
    )(seed_arr)


def random_policy_forward(inputs, seed=0):
    """Pallas equivalent of RandomPolicy.forward(inputs).

    `inputs` is accepted (and ignored) to mirror the PyTorch signature.
    Returns a (1, 6) float32 array of uniforms in [-1, 1).
    """
    del inputs  # forward() ignores its input (batch_size forced to 1)
    # TODO(synk): torch.rand draws from global RNG state each call; here the
    # result is a pure function of `seed` -- callers wanting per-call freshness
    # must thread a new seed per invocation.
    seed_arr = jnp.asarray([int(seed) & 0xFFFFFFFF], dtype=jnp.uint32).view(jnp.int32)
    return _random_policy_pallas(seed_arr)


if __name__ == "__main__":
    key = jax.random.PRNGKey(0)
    # Small example "observation" input consistent with a policy module; its
    # contents/shape do not affect the output (just like the PyTorch module).
    x = jax.random.normal(key, (2, 4, 16, 16), dtype=jnp.float32)

    out = random_policy_forward(x, seed=0)
    out = jax.block_until_ready(out)

    assert out.shape == (1, 6), out.shape
    assert out.dtype == jnp.float32, out.dtype
    assert bool(jnp.all(out >= -1.0)) and bool(jnp.all(out < 1.0))

    # Different seed -> different sample (mirrors per-call randomness when the
    # caller threads a fresh seed).
    out2 = jax.block_until_ready(random_policy_forward(x, seed=1))
    assert not bool(jnp.all(out == out2))

    print("KERNEL_OK")
</pallas_src>

<mosaic_0001>
module attributes {stable_mosaic.version = 11 : i64} {
  func.func @_random_policy_kernel(%arg0: memref<1xi32, #tpu.memory_space<smem>>, %arg1: memref<1x6xf32, #tpu.memory_space<vmem>>) attributes {dimension_semantics = [], scalar_prefetch = 0 : i64, scratch_operands = 0 : i64, tpu.core_type = #tpu.core_type<tc>} {
    %0 = tpu.iota {dimensions = array<i32: 1>} : vector<1x6xi32>
    %c0 = arith.constant 0 : index
    %1 = memref.load %arg0[%c0] : memref<1xi32, #tpu.memory_space<smem>>
    %c1_i32 = arith.constant 1 : i32
    %2 = vector.broadcast %c1_i32 : i32 to vector<1x6xi32>
    %3 = arith.addi %0, %2 : vector<1x6xi32>
    %c-1640531527_i32 = arith.constant -1640531527 : i32
    %4 = vector.broadcast %c-1640531527_i32 : i32 to vector<1x6xi32>
    %5 = arith.muli %3, %4 : vector<1x6xi32>
    %6 = vector.broadcast %1 : i32 to vector<1x6xi32>
    %7 = arith.addi %6, %5 : vector<1x6xi32>
    %8 = tpu.bitcast %7 : vector<1x6xi32> -> vector<1x6xi32>
    %c16_i32 = arith.constant 16 : i32
    %9 = vector.broadcast %c16_i32 : i32 to vector<1x6xi32>
    %10 = arith.shrui %8, %9 : vector<1x6xi32>
    %11 = arith.xori %8, %10 : vector<1x6xi32>
    %c2146121005_i32 = arith.constant 2146121005 : i32
    %12 = vector.broadcast %c2146121005_i32 : i32 to vector<1x6xi32>
    %13 = arith.muli %11, %12 : vector<1x6xi32>
    %c15_i32 = arith.constant 15 : i32
    %14 = vector.broadcast %c15_i32 : i32 to vector<1x6xi32>
    %15 = arith.shrui %13, %14 : vector<1x6xi32>
    %16 = arith.xori %13, %15 : vector<1x6xi32>
    %c-2073254261_i32 = arith.constant -2073254261 : i32
    %17 = vector.broadcast %c-2073254261_i32 : i32 to vector<1x6xi32>
    %18 = arith.muli %16, %17 : vector<1x6xi32>
    %c16_i32_0 = arith.constant 16 : i32
    %19 = vector.broadcast %c16_i32_0 : i32 to vector<1x6xi32>
    %20 = arith.shrui %18, %19 : vector<1x6xi32>
    %21 = arith.xori %18, %20 : vector<1x6xi32>
    %c9_i32 = arith.constant 9 : i32
    %22 = vector.broadcast %c9_i32 : i32 to vector<1x6xi32>
    %23 = arith.shrui %21, %22 : vector<1x6xi32>
    %c1065353216_i32 = arith.constant 1065353216 : i32
    %24 = vector.broadcast %c1065353216_i32 : i32 to vector<1x6xi32>
    %25 = arith.ori %23, %24 : vector<1x6xi32>
    %26 = tpu.bitcast %25 : vector<1x6xi32> -> vector<1x6xf32>
    %cst = arith.constant 2.000000e+00 : f32
    %27 = vector.broadcast %cst : f32 to vector<1x6xf32>
    %28 = arith.mulf %27, %26 : vector<1x6xf32>
    %cst_1 = arith.constant 3.000000e+00 : f32
    %29 = vector.broadcast %cst_1 : f32 to vector<1x6xf32>
    %30 = arith.subf %28, %29 : vector<1x6xf32>
    %c0_2 = arith.constant 0 : index
    %c0_3 = arith.constant 0 : index
    %31 = vector.load %arg1[%c0_2, %c0_3] : memref<1x6xf32, #tpu.memory_space<vmem>>, vector<1x6xf32>
    tpu.vector_store %arg1[%c0_2, %c0_3], %30 {strides = array<i32>} : memref<1x6xf32, #tpu.memory_space<vmem>>, vector<1x6xf32>,
    return
  }
}

</mosaic_0001>

<bundles_post_ra>
// kernel: _random_policy_pallas.1
= control target key start
LH: loop header
LB: loop body
LE: loop exit
PB: predicated region body
PF: predicated region fallthrough
CT: control target
= control target key end

     0   :  { %v10_v0 = vlaneseq  ;;  %s98_s0 = inlined_call_operand.<no memory space> [shape: s32[1], index: 0, kind: input, shape index: {}]   ;;  %s99_s1 = inlined_call_operand.hbm [shape: f32[1,6], index: 1, kind: output, shape index: {}]  }
   0x1   :  { %7 = vsyncpa [#allocation4], 0  ;;  %v15_v3 = vstv %s98_s0  ;;  %s72_s8 = smov [#allocation3]   ;;  %vm30_vm0 = vcmask 40960  }
   0x2   :  { %v11_v1 = vand.u32 127, %v10_v0  ;;  %s38_s9 = sshll.u32 %s72_s8, 4  ;;  %s39_s9 = int_to_ptr.vmem [resolvable:$true] %s38_s9 }
   0x3   :  { %s48_s0 = scalar_lea.vmem %s39_s9, 16  ;;  %s52_s10 = scalar_lea.vmem %s39_s9, 32 }
   0x4   :  { %v13_v2 = vadd.s32 1, %v11_v1  ;;  %p49_p0 = scmp.ne.s32.totalorder %s39_s9, %s48_s0  ;;  %p53_p1 = scmp.lt.s32.totalorder %s39_s9, %s39_s9 }
   0x5   :  { %p54_p2 = scmp.lt.s32.totalorder %s52_s10, %s48_s0 }
   0x6   :  { %v14_v4 = vmul.u32 2654435769, %v13_v2 }
   0x7   :  { %p55_p3 = por %p54_p2, %p53_p1 }
   0x8   :  { %v16_v5 = vadd.s32 %v15_v3, %v14_v4 }
   0x9   :  { %p56_p4 = pnand %p55_p3, %p49_p0 }
   0xa   :  { %v17_v6 = vshrl.u32 %v16_v5, 16 }
   0xc   :  { %v18_v7 = vxor.u32 %v17_v6, %v16_v5 }
   0xe   :  { %v19_v8 = vmul.u32 2146121005, %v18_v7 }
  0x10   :  { %v20_v9 = vshrl.u32 %v19_v8, 15 }
  0x12   :  { %v21_v10 = vxor.u32 %v20_v9, %v19_v8 }
  0x14   :  { %v22_v11 = vmul.u32 2221713035, %v21_v10 }
  0x16   :  { %v23_v12 = vshrl.u32 %v22_v11, 16 }
  0x18   :  { %v24_v13 = vxor.u32 %v23_v12, %v22_v11 }
  0x1a   :  { %v25_v14 = vshrl.u32 %v24_v13, 9 }
  0x1c   :  { %v26_v15 = vor.u32 1065353216, %v25_v14 }
  0x1e   :  { %v28_v16 = vmul.f32 2.0, %v26_v15 }
  0x20   :  { %v46_v17 = vadd.f32 -3.0, %v28_v16 }
  0x22   :  { %31 = vst.msk [vmem:[#allocation3] sm:$0x1] %vm30_vm0, %v46_v17 }
  0x23   :  { %59 = shalt.err (!%p56_p4)
}
  0x24   :  { %s60_s13 = scalar_lea.hbm %s99_s1, 16 }
  0x25   :  { %p61_p5 = scmp.ne.s32.totalorder %s99_s1, %s60_s13  ;;  %p64_p6 = scmp.lt.u32.totalorder %s60_s13, %s99_s1 }
  0x27   :  { %p66_p7 = pnand %p64_p6, %p61_p5 }
  0x29   :  { %69 = shalt.err (!%p66_p7)
}
  0x2a   :  { %41 = dma.vmem_to_hbm [thread:$0]  %s39_s9, 16, %s99_s1, [#allocation4]  }
  0x2b   :  { %70 = dma.done.wait [#allocation4], 16  }
  0x2c   :  { %71 = vsyncadd [#allocation4], 4294967280 }
  0x2d   :  { %45 = vsyncpa [#allocation4], 1 }

</bundles_post_ra>
